<compile_context>
chip_gen: v7x
topology: tpu7x:2x2x1
jax: 0.10.0
libtpu: 0.0.40
codegen_flags: <defaults>
</compile_context>

<pallas_src>
import functools

import jax
import jax.numpy as jnp
from jax import lax
from jax.experimental import pallas as pl
from jax.experimental.pallas import tpu as pltpu


def _mhsa_kernel(x_ref, wqkv_ref, bqkv_ref, wp_ref, bp_ref,
                 out_ref, attn_ref, *, d_k, head_block):
    g = pl.program_id(1)

    @pl.when(g == 0)
    def _():
        # Initialize the resident output block with the projection bias; the
        # per-head-block partial projections accumulate on top of it.
        out_ref[0] = jnp.broadcast_to(bp_ref[...], out_ref.shape[1:]).astype(out_ref.dtype)

    x = x_ref[0].astype(jnp.bfloat16)               # [S, D]
    w = wqkv_ref[0]                                 # [D, 3*Hb*d_k] bf16

    # Fused (scaled-Q | K | V) projection for this head block: one MXU pass,
    # f32 accumulation. The 1/sqrt(d_k) scale is already folded into Q.
    qkv = jnp.dot(x, w, preferred_element_type=jnp.float32) + bqkv_ref[0]

    qw = head_block * d_k
    q_all = qkv[:, :qw].astype(jnp.bfloat16)        # [S, Hb*d_k]
    k_all = qkv[:, qw:2 * qw].astype(jnp.bfloat16)  # [S, Hb*d_k]
    v_all = qkv[:, 2 * qw:].astype(jnp.bfloat16)    # [S, Hb*d_k]

    # TODO(synk): if d_k % 128 != 0 at large shapes, pad each head's slab to a
    # 128-lane boundary so the per-head slices below stay relayout-free.
    ctx_parts = []
    for h in range(head_block):                     # static unroll over the block
        lo = h * d_k
        q = q_all[:, lo:lo + d_k]
        k = k_all[:, lo:lo + d_k]
        v = v_all[:, lo:lo + d_k]

        # scores = q_scaled @ k^T, contracting the last dim of both operands
        # (no materialized transpose -> feeds the MXU directly).
        s = lax.dot_general(q, k, (((1,), (1,)), ((), ())),
                            preferred_element_type=jnp.float32)      # [S, S] f32

        # Numerically-stable softmax; normalization via approx reciprocal
        # (EUP slot). Its ~1e-3 relative error is below the bf16 resolution of
        # the stored attention matrix.
        m = jnp.max(s, axis=-1, keepdims=True)
        e = jnp.exp(s - m)
        a = e * pl.reciprocal(jnp.sum(e, axis=-1, keepdims=True), approx=True)

        attn_ref[0, h] = a.astype(attn_ref.dtype)
        ctx_parts.append(jnp.dot(a.astype(jnp.bfloat16), v,
                                 preferred_element_type=jnp.float32))  # [S, d_k]

    # One wide output projection for the whole head block (K = Hb*d_k),
    # accumulated straight into the resident output block.
    ctx = jnp.concatenate(ctx_parts, axis=-1).astype(jnp.bfloat16)     # [S, Hb*d_k]
    out_ref[0] += jnp.dot(ctx, wp_ref[0], preferred_element_type=jnp.float32)


def _prep_params(params, num_heads, head_block):
    """Pack weights into head-blocked, MXU-friendly slabs.

    Weights go to bf16 (MXU inputs); biases stay f32. The 1/sqrt(d_k) softmax
    scale is folded into the Q weights/bias so the kernel never multiplies the
    [S, S] score tile.
    """
    wq, bq, wk, bk, wv, bv, wp, bp = params
    D = wq.shape[0]
    d_k = D // num_heads
    n_blocks = num_heads // head_block
    scale = 1.0 / (float(d_k) ** 0.5)

    def w_slab(w):   # [D, D] -> [n_blocks, D, Hb*d_k], head-major lanes
        wh = w.reshape(D, num_heads, d_k).transpose(1, 0, 2)          # [H, D, d_k]
        return (wh.reshape(n_blocks, head_block, D, d_k)
                  .transpose(0, 2, 1, 3)
                  .reshape(n_blocks, D, head_block * d_k))

    def b_slab(b):   # [1, D] -> [n_blocks, 1, Hb*d_k]
        return b.reshape(n_blocks, 1, head_block * d_k)

    wqkv = jnp.concatenate([w_slab(wq * scale), w_slab(wk), w_slab(wv)], axis=-1)
    bqkv = jnp.concatenate([b_slab(bq * scale), b_slab(bk), b_slab(bv)], axis=-1)
    wp_b = wp.reshape(n_blocks, head_block * d_k, D)                  # ctx rows are head-major
    return (wqkv.astype(jnp.bfloat16), bqkv.astype(jnp.float32),
            wp_b.astype(jnp.bfloat16), bp.astype(jnp.float32))


def _vmem_limit_bytes():
    # v5e/v6e have 128 MiB physical VMEM, v7x only 64 MiB; leave ~25% headroom.
    cap = 128 * 1024 * 1024
    try:
        cap = getattr(pltpu.get_tpu_info(), "vmem_capacity_bytes", cap)
    except Exception:
        pass
    return int(min(cap * 3 // 4, 96 * 1024 * 1024))


def mhsa_pallas(x, params, num_heads, *, attn_dtype=jnp.bfloat16, head_block=None):
    """x: [B, S, D] float32. Returns (out [B, S, D] f32, attn [B, H, S, S] attn_dtype)."""
    B, S, D = x.shape
    d_k = D // num_heads
    if head_block is None:
        # Aim for ~256 q/k/v output lanes per step to feed the 256-wide MXU.
        head_block = max(1, min(num_heads, 256 // max(d_k, 1)))
    while num_heads % head_block:
        head_block -= 1
    n_blocks = num_heads // head_block

    wqkv, bqkv, wp_b, bp = _prep_params(params, num_heads, head_block)
    kernel = functools.partial(_mhsa_kernel, d_k=d_k, head_block=head_block)

    out, attn = pl.pallas_call(
        kernel,
        out_shape=(
            jax.ShapeDtypeStruct((B, S, D), jnp.float32),
            jax.ShapeDtypeStruct((B, num_heads, S, S), attn_dtype),
        ),
        grid_spec=pltpu.PrefetchScalarGridSpec(
            num_scalar_prefetch=0,
            grid=(B, n_blocks),
            in_specs=[
                pl.BlockSpec((1, S, D), lambda b, g: (b, 0, 0)),                    # x (f32, cast in-kernel)
                pl.BlockSpec((1, D, 3 * head_block * d_k), lambda b, g: (g, 0, 0)),  # fused QKV weights
                pl.BlockSpec((1, 1, 3 * head_block * d_k), lambda b, g: (g, 0, 0)),  # fused QKV bias
                pl.BlockSpec((1, head_block * d_k, D), lambda b, g: (g, 0, 0)),      # proj weight rows
                pl.BlockSpec((1, D), lambda b, g: (0, 0)),                           # proj bias
            ],
            out_specs=[
                pl.BlockSpec((1, S, D), lambda b, g: (b, 0, 0)),                     # out (resident over g)
                pl.BlockSpec((1, head_block, S, S), lambda b, g: (b, g, 0, 0)),      # attn per (b, g)
            ],
        ),
        compiler_params=pltpu.CompilerParams(
            # NOTE: on v7x with B == 1 one TensorCore idles (the head axis is a
            # reduction); split heads across cores there if that case matters.
            dimension_semantics=("parallel", "arbitrary"),
            vmem_limit_bytes=_vmem_limit_bytes(),
        ),
    )(x, wqkv, bqkv, wp_b, bp)
    return out, attn


def init_params(key, d_model):
    """Deterministic synthetic parameters. Weights stored as [d_in, d_out]."""
    keys = jax.random.split(key, 8)
    scale = 1.0 / jnp.sqrt(jnp.float32(d_model))

    def w(k):
        return jax.random.uniform(k, (d_model, d_model), jnp.float32,
                                  minval=-scale, maxval=scale)

    def b(k):
        return jax.random.uniform(k, (1, d_model), jnp.float32,
                                  minval=-scale, maxval=scale)

    return (w(keys[0]), b(keys[1]),   # query
            w(keys[2]), b(keys[3]),   # key
            w(keys[4]), b(keys[5]),   # value
            w(keys[6]), b(keys[7]))   # proj


def mhsa_reference(x, params, num_heads):
    """Pure-JAX f32 reference mirroring the PyTorch forward."""
    B, S, D = x.shape
    d_k = D // num_heads
    wq, bq, wk, bk, wv, bv, wp, bp = params
    q = (x @ wq + bq).reshape(B, S, num_heads, d_k).transpose(0, 2, 1, 3)
    k = (x @ wk + bk).reshape(B, S, num_heads, d_k).transpose(0, 2, 1, 3)
    v = (x @ wv + bv).reshape(B, S, num_heads, d_k).transpose(0, 2, 1, 3)
    scores = jnp.einsum('bhqd,bhkd->bhqk', q, k) / jnp.sqrt(jnp.float32(d_k))
    attn = jax.nn.softmax(scores, axis=-1)
    ctx = jnp.einsum('bhqk,bhkd->bhqd', attn, v)
    ctx = ctx.transpose(0, 2, 1, 3).reshape(B, S, D)
    return ctx @ wp + bp, attn


if __name__ == "__main__":
    B, S, D, H = 2, 8, 32, 4

    key = jax.random.PRNGKey(0)
    kx, kp = jax.random.split(key)
    x = jax.random.normal(kx, (B, S, D), jnp.float32)
    params = init_params(kp, D)

    ref_out, ref_attn = mhsa_reference(x, params, H)

    # Default path: all heads in one block, bf16 attention writeback.
    out, attn = mhsa_pallas(x, params, H)
    out = jax.block_until_ready(out)
    attn = jax.block_until_ready(attn)
    assert out.shape == (B, S, D) and out.dtype == jnp.float32
    assert attn.shape == (B, H, S, S)
    # bf16 MXU (f32 accumulation), approx softmax reciprocal and bf16 attn
    # storage -> expected error is O(1e-3); tolerances reflect that.
    assert jnp.allclose(out, ref_out, atol=2e-2, rtol=2e-2)
    assert jnp.allclose(attn.astype(jnp.float32), ref_attn, atol=2e-2, rtol=2e-2)

    # Also exercise the multi-head-block path: head_block=1 makes the second
    # grid axis a length-H reduction accumulating into the resident out block.
    out1, attn1 = mhsa_pallas(x, params, H, head_block=1, attn_dtype=jnp.float32)
    out1 = jax.block_until_ready(out1)
    attn1 = jax.block_until_ready(attn1)
    assert jnp.allclose(out1, ref_out, atol=2e-2, rtol=2e-2)
    assert jnp.allclose(attn1, ref_attn, atol=1e-2, rtol=1e-2)

    print("KERNEL_OK")
</pallas_src>

<mosaic_0001>
module attributes {stable_mosaic.version = 11 : i64} {
  func.func @_mhsa_kernel(%arg0: i32, %arg1: i32, %arg2: memref<1x8x32xf32, #tpu.memory_space<vmem>>, %arg3: memref<1x32x96xbf16, #tpu.memory_space<vmem>>, %arg4: memref<1x1x96xf32, #tpu.memory_space<vmem>>, %arg5: memref<1x32x32xbf16, #tpu.memory_space<vmem>>, %arg6: memref<1x32xf32, #tpu.memory_space<vmem>>, %arg7: memref<1x8x32xf32, #tpu.memory_space<vmem>>, %arg8: memref<1x4x8x8xbf16, #tpu.memory_space<vmem>>) attributes {dimension_semantics = [#tpu.dimension_semantics<parallel>, #tpu.dimension_semantics<arbitrary>], iteration_bounds = array<i64: 2, 1>, scalar_prefetch = 0 : i64, scratch_operands = 0 : i64, tpu.core_type = #tpu.core_type<tc>, window_params = [{transform_indices = @transform_0, window_bounds = array<i64: 1, 8, 32>}, {transform_indices = @transform_1, window_bounds = array<i64: 1, 32, 96>}, {transform_indices = @transform_2, window_bounds = array<i64: 1, 1, 96>}, {transform_indices = @transform_3, window_bounds = array<i64: 1, 32, 32>}, {pipeline_mode = #tpu.pipeline_mode<synchronous>, transform_indices = @transform_4, window_bounds = array<i64: 1, 32>}, {transform_indices = @transform_5, window_bounds = array<i64: 1, 8, 32>}, {transform_indices = @transform_6, window_bounds = array<i64: 1, 4, 8, 8>}]} {
    %c0_i32 = arith.constant 0 : i32
    %0 = arith.cmpi eq, %arg1, %c0_i32 : i32
    %1 = arith.extui %0 : i1 to i32
    %c0_i32_0 = arith.constant 0 : i32
    %2 = arith.cmpi ne, %1, %c0_i32_0 : i32
    scf.if %2 {
      %c0_48 = arith.constant 0 : index
      %c0_49 = arith.constant 0 : index
      %110 = vector.load %arg6[%c0_48, %c0_49] : memref<1x32xf32, #tpu.memory_space<vmem>>, vector<1x32xf32>
      %111 = vector.shape_cast %110 : vector<1x32xf32> to vector<1x32xf32>
      %112 = vector.broadcast %111 : vector<1x32xf32> to vector<8x32xf32>
      %c0_50 = arith.constant 0 : index
      %c0_51 = arith.constant 0 : index
      %c0_52 = arith.constant 0 : index
      %113 = vector.load %arg7[%c0_50, %c0_51, %c0_52] : memref<1x8x32xf32, #tpu.memory_space<vmem>>, vector<1x8x32xf32>
      %114 = vector.shape_cast %113 : vector<1x8x32xf32> to vector<8x32xf32>
      %115 = vector.shape_cast %112 : vector<8x32xf32> to vector<1x8x32xf32>
      tpu.vector_store %arg7[%c0_50, %c0_51, %c0_52], %115 {strides = array<i32>} : memref<1x8x32xf32, #tpu.memory_space<vmem>>, vector<1x8x32xf32>,
    } else {
    }
    %c0 = arith.constant 0 : index
    %c0_1 = arith.constant 0 : index
    %c0_2 = arith.constant 0 : index
    %3 = vector.load %arg2[%c0, %c0_1, %c0_2] : memref<1x8x32xf32, #tpu.memory_space<vmem>>, vector<1x8x32xf32>
    %4 = vector.shape_cast %3 : vector<1x8x32xf32> to vector<8x32xf32>
    %5 = arith.truncf %4 : vector<8x32xf32> to vector<8x32xbf16>
    %c0_3 = arith.constant 0 : index
    %c0_4 = arith.constant 0 : index
    %c0_5 = arith.constant 0 : index
    %6 = vector.load %arg3[%c0_3, %c0_4, %c0_5] : memref<1x32x96xbf16, #tpu.memory_space<vmem>>, vector<1x32x96xbf16>
    %7 = vector.shape_cast %6 : vector<1x32x96xbf16> to vector<32x96xbf16>
    %cst = arith.constant dense<0.000000e+00> : vector<8x96xf32>
    %8 = tpu.matmul %5, %7, %cst {dimension_numbers = #tpu.dot_dimension_numbers<[1], [0], [0], [1], [0, 0, 1, 1], [], []>} : vector<8x32xbf16>, vector<32x96xbf16>, vector<8x96xf32> -> vector<8x96xf32>
    %c0_6 = arith.constant 0 : index
    %c0_7 = arith.constant 0 : index
    %c0_8 = arith.constant 0 : index
    %9 = vector.load %arg4[%c0_6, %c0_7, %c0_8] : memref<1x1x96xf32, #tpu.memory_space<vmem>>, vector<1x1x96xf32>
    %10 = vector.shape_cast %9 : vector<1x1x96xf32> to vector<1x96xf32>
    %11 = vector.broadcast %10 : vector<1x96xf32> to vector<8x96xf32>
    %12 = arith.addf %8, %11 : vector<8x96xf32>
    %13 = vector.extract_strided_slice %12 {offsets = [0, 0], sizes = [8, 32], strides = [1, 1]} : vector<8x96xf32> to vector<8x32xf32>
    %14 = arith.truncf %13 : vector<8x32xf32> to vector<8x32xbf16>
    %15 = vector.extract_strided_slice %12 {offsets = [0, 32], sizes = [8, 32], strides = [1, 1]} : vector<8x96xf32> to vector<8x32xf32>
    %16 = arith.truncf %15 : vector<8x32xf32> to vector<8x32xbf16>
    %17 = vector.extract_strided_slice %12 {offsets = [0, 64], sizes = [8, 32], strides = [1, 1]} : vector<8x96xf32> to vector<8x32xf32>
    %18 = arith.truncf %17 : vector<8x32xf32> to vector<8x32xbf16>
    %19 = vector.extract_strided_slice %14 {offsets = [0, 0], sizes = [8, 8], strides = [1, 1]} : vector<8x32xbf16> to vector<8x8xbf16>
    %20 = vector.extract_strided_slice %16 {offsets = [0, 0], sizes = [8, 8], strides = [1, 1]} : vector<8x32xbf16> to vector<8x8xbf16>
    %21 = vector.extract_strided_slice %18 {offsets = [0, 0], sizes = [8, 8], strides = [1, 1]} : vector<8x32xbf16> to vector<8x8xbf16>
    %cst_9 = arith.constant dense<0.000000e+00> : vector<8x8xf32>
    %22 = tpu.matmul %19, %20, %cst_9 {dimension_numbers = #tpu.dot_dimension_numbers<[1], [1], [0], [0], [0, 0, 1, 0], [], []>} : vector<8x8xbf16>, vector<8x8xbf16>, vector<8x8xf32> -> vector<8x8xf32>
    %cst_10 = arith.constant dense<0xFF800000> : vector<8xf32>
    %23 = vector.multi_reduction <maximumf>, %22, %cst_10 [1] : vector<8x8xf32> to vector<8xf32>
    %24 = vector.shape_cast %23 : vector<8xf32> to vector<8x1xf32>
    %25 = vector.broadcast %24 : vector<8x1xf32> to vector<8x8xf32>
    %26 = arith.subf %22, %25 : vector<8x8xf32>
    %27 = math.exp %26 : vector<8x8xf32>
    %cst_11 = arith.constant dense<0.000000e+00> : vector<8xf32>
    %28 = vector.multi_reduction <add>, %27, %cst_11 [1] : vector<8x8xf32> to vector<8xf32>
    %29 = vector.shape_cast %28 : vector<8xf32> to vector<8x1xf32>
    %30 = tpu.reciprocal %29 {approx = true} : vector<8x1xf32> -> vector<8x1xf32>
    %31 = vector.broadcast %30 : vector<8x1xf32> to vector<8x8xf32>
    %32 = arith.mulf %27, %31 : vector<8x8xf32>
    %33 = arith.truncf %32 : vector<8x8xf32> to vector<8x8xbf16>
    %c0_12 = arith.constant 0 : index
    %c0_13 = arith.constant 0 : index
    %c0_14 = arith.constant 0 : index
    %c0_15 = arith.constant 0 : index
    %34 = vector.load %arg8[%c0_12, %c0_13, %c0_14, %c0_15] : memref<1x4x8x8xbf16, #tpu.memory_space<vmem>>, vector<1x1x8x8xbf16>
    %35 = vector.shape_cast %34 : vector<1x1x8x8xbf16> to vector<8x8xbf16>
    %36 = vector.shape_cast %33 : vector<8x8xbf16> to vector<1x1x8x8xbf16>
    tpu.vector_store %arg8[%c0_12, %c0_13, %c0_14, %c0_15], %36 {strides = array<i32>} : memref<1x4x8x8xbf16, #tpu.memory_space<vmem>>, vector<1x1x8x8xbf16>,
    %37 = arith.truncf %32 : vector<8x8xf32> to vector<8x8xbf16>
    %cst_16 = arith.constant dense<0.000000e+00> : vector<8x8xf32>
    %38 = tpu.matmul %37, %21, %cst_16 {dimension_numbers = #tpu.dot_dimension_numbers<[1], [0], [0], [1], [0, 0, 1, 1], [], []>} : vector<8x8xbf16>, vector<8x8xbf16>, vector<8x8xf32> -> vector<8x8xf32>
    %39 = vector.extract_strided_slice %14 {offsets = [0, 8], sizes = [8, 8], strides = [1, 1]} : vector<8x32xbf16> to vector<8x8xbf16>
    %40 = vector.extract_strided_slice %16 {offsets = [0, 8], sizes = [8, 8], strides = [1, 1]} : vector<8x32xbf16> to vector<8x8xbf16>
    %41 = vector.extract_strided_slice %18 {offsets = [0, 8], sizes = [8, 8], strides = [1, 1]} : vector<8x32xbf16> to vector<8x8xbf16>
    %cst_17 = arith.constant dense<0.000000e+00> : vector<8x8xf32>
    %42 = tpu.matmul %39, %40, %cst_17 {dimension_numbers = #tpu.dot_dimension_numbers<[1], [1], [0], [0], [0, 0, 1, 0], [], []>} : vector<8x8xbf16>, vector<8x8xbf16>, vector<8x8xf32> -> vector<8x8xf32>
    %cst_18 = arith.constant dense<0xFF800000> : vector<8xf32>
    %43 = vector.multi_reduction <maximumf>, %42, %cst_18 [1] : vector<8x8xf32> to vector<8xf32>
    %44 = vector.shape_cast %43 : vector<8xf32> to vector<8x1xf32>
    %45 = vector.broadcast %44 : vector<8x1xf32> to vector<8x8xf32>
    %46 = arith.subf %42, %45 : vector<8x8xf32>
    %47 = math.exp %46 : vector<8x8xf32>
    %cst_19 = arith.constant dense<0.000000e+00> : vector<8xf32>
    %48 = vector.multi_reduction <add>, %47, %cst_19 [1] : vector<8x8xf32> to vector<8xf32>
    %49 = vector.shape_cast %48 : vector<8xf32> to vector<8x1xf32>
    %50 = tpu.reciprocal %49 {approx = true} : vector<8x1xf32> -> vector<8x1xf32>
    %51 = vector.broadcast %50 : vector<8x1xf32> to vector<8x8xf32>
    %52 = arith.mulf %47, %51 : vector<8x8xf32>
    %53 = arith.truncf %52 : vector<8x8xf32> to vector<8x8xbf16>
    %c0_20 = arith.constant 0 : index
    %c1 = arith.constant 1 : index
    %c0_21 = arith.constant 0 : index
    %c0_22 = arith.constant 0 : index
    %54 = vector.load %arg8[%c0_20, %c1, %c0_21, %c0_22] : memref<1x4x8x8xbf16, #tpu.memory_space<vmem>>, vector<1x1x8x8xbf16>
    %55 = vector.shape_cast %54 : vector<1x1x8x8xbf16> to vector<8x8xbf16>
    %56 = vector.shape_cast %53 : vector<8x8xbf16> to vector<1x1x8x8xbf16>
    tpu.vector_store %arg8[%c0_20, %c1, %c0_21, %c0_22], %56 {strides = array<i32>} : memref<1x4x8x8xbf16, #tpu.memory_space<vmem>>, vector<1x1x8x8xbf16>,
    %57 = arith.truncf %52 : vector<8x8xf32> to vector<8x8xbf16>
    %cst_23 = arith.constant dense<0.000000e+00> : vector<8x8xf32>
    %58 = tpu.matmul %57, %41, %cst_23 {dimension_numbers = #tpu.dot_dimension_numbers<[1], [0], [0], [1], [0, 0, 1, 1], [], []>} : vector<8x8xbf16>, vector<8x8xbf16>, vector<8x8xf32> -> vector<8x8xf32>
    %59 = vector.extract_strided_slice %14 {offsets = [0, 16], sizes = [8, 8], strides = [1, 1]} : vector<8x32xbf16> to vector<8x8xbf16>
    %60 = vector.extract_strided_slice %16 {offsets = [0, 16], sizes = [8, 8], strides = [1, 1]} : vector<8x32xbf16> to vector<8x8xbf16>
    %61 = vector.extract_strided_slice %18 {offsets = [0, 16], sizes = [8, 8], strides = [1, 1]} : vector<8x32xbf16> to vector<8x8xbf16>
    %cst_24 = arith.constant dense<0.000000e+00> : vector<8x8xf32>
    %62 = tpu.matmul %59, %60, %cst_24 {dimension_numbers = #tpu.dot_dimension_numbers<[1], [1], [0], [0], [0, 0, 1, 0], [], []>} : vector<8x8xbf16>, vector<8x8xbf16>, vector<8x8xf32> -> vector<8x8xf32>
    %cst_25 = arith.constant dense<0xFF800000> : vector<8xf32>
    %63 = vector.multi_reduction <maximumf>, %62, %cst_25 [1] : vector<8x8xf32> to vector<8xf32>
    %64 = vector.shape_cast %63 : vector<8xf32> to vector<8x1xf32>
    %65 = vector.broadcast %64 : vector<8x1xf32> to vector<8x8xf32>
    %66 = arith.subf %62, %65 : vector<8x8xf32>
    %67 = math.exp %66 : vector<8x8xf32>
    %cst_26 = arith.constant dense<0.000000e+00> : vector<8xf32>
    %68 = vector.multi_reduction <add>, %67, %cst_26 [1] : vector<8x8xf32> to vector<8xf32>
    %69 = vector.shape_cast %68 : vector<8xf32> to vector<8x1xf32>
    %70 = tpu.reciprocal %69 {approx = true} : vector<8x1xf32> -> vector<8x1xf32>
    %71 = vector.broadcast %70 : vector<8x1xf32> to vector<8x8xf32>
    %72 = arith.mulf %67, %71 : vector<8x8xf32>
    %73 = arith.truncf %72 : vector<8x8xf32> to vector<8x8xbf16>
    %c0_27 = arith.constant 0 : index
    %c2 = arith.constant 2 : index
    %c0_28 = arith.constant 0 : index
    %c0_29 = arith.constant 0 : index
    %74 = vector.load %arg8[%c0_27, %c2, %c0_28, %c0_29] : memref<1x4x8x8xbf16, #tpu.memory_space<vmem>>, vector<1x1x8x8xbf16>
    %75 = vector.shape_cast %74 : vector<1x1x8x8xbf16> to vector<8x8xbf16>
    %76 = vector.shape_cast %73 : vector<8x8xbf16> to vector<1x1x8x8xbf16>
    tpu.vector_store %arg8[%c0_27, %c2, %c0_28, %c0_29], %76 {strides = array<i32>} : memref<1x4x8x8xbf16, #tpu.memory_space<vmem>>, vector<1x1x8x8xbf16>,
    %77 = arith.truncf %72 : vector<8x8xf32> to vector<8x8xbf16>
    %cst_30 = arith.constant dense<0.000000e+00> : vector<8x8xf32>
    %78 = tpu.matmul %77, %61, %cst_30 {dimension_numbers = #tpu.dot_dimension_numbers<[1], [0], [0], [1], [0, 0, 1, 1], [], []>} : vector<8x8xbf16>, vector<8x8xbf16>, vector<8x8xf32> -> vector<8x8xf32>
    %79 = vector.extract_strided_slice %14 {offsets = [0, 24], sizes = [8, 8], strides = [1, 1]} : vector<8x32xbf16> to vector<8x8xbf16>
    %80 = vector.extract_strided_slice %16 {offsets = [0, 24], sizes = [8, 8], strides = [1, 1]} : vector<8x32xbf16> to vector<8x8xbf16>
    %81 = vector.extract_strided_slice %18 {offsets = [0, 24], sizes = [8, 8], strides = [1, 1]} : vector<8x32xbf16> to vector<8x8xbf16>
    %cst_31 = arith.constant dense<0.000000e+00> : vector<8x8xf32>
    %82 = tpu.matmul %79, %80, %cst_31 {dimension_numbers = #tpu.dot_dimension_numbers<[1], [1], [0], [0], [0, 0, 1, 0], [], []>} : vector<8x8xbf16>, vector<8x8xbf16>, vector<8x8xf32> -> vector<8x8xf32>
    %cst_32 = arith.constant dense<0xFF800000> : vector<8xf32>
    %83 = vector.multi_reduction <maximumf>, %82, %cst_32 [1] : vector<8x8xf32> to vector<8xf32>
    %84 = vector.shape_cast %83 : vector<8xf32> to vector<8x1xf32>
    %85 = vector.broadcast %84 : vector<8x1xf32> to vector<8x8xf32>
    %86 = arith.subf %82, %85 : vector<8x8xf32>
    %87 = math.exp %86 : vector<8x8xf32>
    %cst_33 = arith.constant dense<0.000000e+00> : vector<8xf32>
    %88 = vector.multi_reduction <add>, %87, %cst_33 [1] : vector<8x8xf32> to vector<8xf32>
    %89 = vector.shape_cast %88 : vector<8xf32> to vector<8x1xf32>
    %90 = tpu.reciprocal %89 {approx = true} : vector<8x1xf32> -> vector<8x1xf32>
    %91 = vector.broadcast %90 : vector<8x1xf32> to vector<8x8xf32>
    %92 = arith.mulf %87, %91 : vector<8x8xf32>
    %93 = arith.truncf %92 : vector<8x8xf32> to vector<8x8xbf16>
    %c0_34 = arith.constant 0 : index
    %c3 = arith.constant 3 : index
    %c0_35 = arith.constant 0 : index
    %c0_36 = arith.constant 0 : index
    %94 = vector.load %arg8[%c0_34, %c3, %c0_35, %c0_36] : memref<1x4x8x8xbf16, #tpu.memory_space<vmem>>, vector<1x1x8x8xbf16>
    %95 = vector.shape_cast %94 : vector<1x1x8x8xbf16> to vector<8x8xbf16>
    %96 = vector.shape_cast %93 : vector<8x8xbf16> to vector<1x1x8x8xbf16>
    tpu.vector_store %arg8[%c0_34, %c3, %c0_35, %c0_36], %96 {strides = array<i32>} : memref<1x4x8x8xbf16, #tpu.memory_space<vmem>>, vector<1x1x8x8xbf16>,
    %97 = arith.truncf %92 : vector<8x8xf32> to vector<8x8xbf16>
    %cst_37 = arith.constant dense<0.000000e+00> : vector<8x8xf32>
    %98 = tpu.matmul %97, %81, %cst_37 {dimension_numbers = #tpu.dot_dimension_numbers<[1], [0], [0], [1], [0, 0, 1, 1], [], []>} : vector<8x8xbf16>, vector<8x8xbf16>, vector<8x8xf32> -> vector<8x8xf32>
    %99 = tpu.concatenate %38, %58, %78, %98 in 1 : vector<8x8xf32>, vector<8x8xf32>, vector<8x8xf32>, vector<8x8xf32> -> vector<8x32xf32>
    %100 = arith.truncf %99 : vector<8x32xf32> to vector<8x32xbf16>
    %c0_38 = arith.constant 0 : index
    %c0_39 = arith.constant 0 : index
    %c0_40 = arith.constant 0 : index
    %101 = vector.load %arg7[%c0_38, %c0_39, %c0_40] : memref<1x8x32xf32, #tpu.memory_space<vmem>>, vector<1x8x32xf32>
    %102 = vector.shape_cast %101 : vector<1x8x32xf32> to vector<8x32xf32>
    %c0_41 = arith.constant 0 : index
    %c0_42 = arith.constant 0 : index
    %c0_43 = arith.constant 0 : index
    %103 = vector.load %arg5[%c0_41, %c0_42, %c0_43] : memref<1x32x32xbf16, #tpu.memory_space<vmem>>, vector<1x32x32xbf16>
    %104 = vector.shape_cast %103 : vector<1x32x32xbf16> to vector<32x32xbf16>
    %cst_44 = arith.constant dense<0.000000e+00> : vector<8x32xf32>
    %105 = tpu.matmul %100, %104, %cst_44 {dimension_numbers = #tpu.dot_dimension_numbers<[1], [0], [0], [1], [0, 0, 1, 1], [], []>} : vector<8x32xbf16>, vector<32x32xbf16>, vector<8x32xf32> -> vector<8x32xf32>
    %106 = arith.addf %102, %105 : vector<8x32xf32>
    %c0_45 = arith.constant 0 : index
    %c0_46 = arith.constant 0 : index
    %c0_47 = arith.constant 0 : index
    %107 = vector.load %arg7[%c0_45, %c0_46, %c0_47] : memref<1x8x32xf32, #tpu.memory_space<vmem>>, vector<1x8x32xf32>
    %108 = vector.shape_cast %107 : vector<1x8x32xf32> to vector<8x32xf32>
    %109 = vector.shape_cast %106 : vector<8x32xf32> to vector<1x8x32xf32>
    tpu.vector_store %arg7[%c0_45, %c0_46, %c0_47], %109 {strides = array<i32>} : memref<1x8x32xf32, #tpu.memory_space<vmem>>, vector<1x8x32xf32>,
    return
  }
  func.func @transform_0(%arg0: i32, %arg1: i32) -> (i32, i32, i32) {
    %c0_i32 = arith.constant 0 : i32
    %c0_i32_0 = arith.constant 0 : i32
    %c0_i32_1 = arith.constant 0 : i32
    return %arg0, %c0_i32, %c0_i32_0 : i32, i32, i32
  }
  func.func @transform_1(%arg0: i32, %arg1: i32) -> (i32, i32, i32) {
    %c0_i32 = arith.constant 0 : i32
    %c0_i32_0 = arith.constant 0 : i32
    %c0_i32_1 = arith.constant 0 : i32
    return %arg1, %c0_i32, %c0_i32_0 : i32, i32, i32
  }
  func.func @transform_2(%arg0: i32, %arg1: i32) -> (i32, i32, i32) {
    %c0_i32 = arith.constant 0 : i32
    %c0_i32_0 = arith.constant 0 : i32
    %c0_i32_1 = arith.constant 0 : i32
    return %arg1, %c0_i32, %c0_i32_0 : i32, i32, i32
  }
  func.func @transform_3(%arg0: i32, %arg1: i32) -> (i32, i32, i32) {
    %c0_i32 = arith.constant 0 : i32
    %c0_i32_0 = arith.constant 0 : i32
    %c0_i32_1 = arith.constant 0 : i32
    return %arg1, %c0_i32, %c0_i32_0 : i32, i32, i32
  }
  func.func @transform_4(%arg0: i32, %arg1: i32) -> (i32, i32) {
    %c0_i32 = arith.constant 0 : i32
    %c0_i32_0 = arith.constant 0 : i32
    %c0_i32_1 = arith.constant 0 : i32
    return %c0_i32, %c0_i32_0 : i32, i32
  }
  func.func @transform_5(%arg0: i32, %arg1: i32) -> (i32, i32, i32) {
    %c0_i32 = arith.constant 0 : i32
    %c0_i32_0 = arith.constant 0 : i32
    %c0_i32_1 = arith.constant 0 : i32
    return %arg0, %c0_i32, %c0_i32_0 : i32, i32, i32
  }
  func.func @transform_6(%arg0: i32, %arg1: i32) -> (i32, i32, i32, i32) {
    %c0_i32 = arith.constant 0 : i32
    %c0_i32_0 = arith.constant 0 : i32
    %c0_i32_1 = arith.constant 0 : i32
    return %arg0, %arg1, %c0_i32, %c0_i32_0 : i32, i32, i32, i32
  }
}

</mosaic_0001>

<bundles_post_ra>
// kernel: tpu_custom_call.1
= control target key start
LH: loop header
LB: loop body
LE: loop exit
PB: predicated region body
PF: predicated region fallthrough
CT: control target
= control target key end

     0   :  { %s2209_s0 = inlined_call_operand.hbm [shape: f32[2,8,32], index: 0, kind: input, shape index: {}]   ;;  %s2210_s1 = inlined_call_operand.hbm [shape: bf16[1,32,96], index: 1, kind: input, shape index: {}]   ;;  %s2211_s2 = inlined_call_operand.hbm [shape: f32[1,1,96], index: 2, kind: input, shape index: {}]   ;;  %s2212_s3 = inlined_call_operand.hbm [shape: bf16[1,32,32], index: 3, kind: input, shape index: {}]   ;;  %s2213_s4 = inlined_call_operand.hbm [shape: f32[1,32], index: 4, kind: input, shape index: {}]   ;;  %s2214_s5 = inlined_call_operand.hbm [shape: f32[2,8,32], index: 5, kind: output, shape index: {0}]   ;;  %s2215_s6 = inlined_call_operand.hbm [shape: bf16[2,4,8,8], index: 6, kind: output, shape index: {1}]  }
   0x1   :  { %2221 = sst [smem:[#allocation19_spill]] %s2210_s1 }
   0x2   :  { %12 = vsyncpa [#allocation3], 0 }
   0x3   :  { %14 = vsyncpa [#allocation3 + $0x1], 0 }
   0x4   :  { %15 = vsyncpa [#allocation6], 0 }
   0x5   :  { %16 = vsyncpa [#allocation9], 0 }
   0x6   :  { %17 = vsyncpa [#allocation4], 0 }
   0x7   :  { %19 = vsyncpa [#allocation4 + $0x1], 0 }
   0x8   :  { %20 = vsyncpa [#allocation13], 0 }
   0x9   :  { %22 = vsyncpa [#allocation13 + $0x1], 0  ;;  %s1782_s21 = smov 0   ;;  %s1784_s22 = smov 0  }
   0xa   :  { %s1786_s23 = smov 0   ;;  %s1788_s24 = smov 0  }
   0xb   :  { %s1790_s25 = smov 0   ;;  %s1792_s26 = smov 0  }
   0xc LB: > { %s2216_s27 = sadd.s32 4294967295, %s1719_s26   ;;  %p1179_p0 = scmp.ge.s32.totalorder %s1719_s26, 1  ;;  %s1719_s26 = sphi %s1792_s26, %s28_s26   ;;  %s1715_s25 = sphi %s1790_s25, %s2243_s25   ;;  %s1711_s24 = sphi %s1788_s24, %s2242_s24   ;;  %s1707_s23 = sphi %s1786_s23, %s2241_s23   ;;  %s1703_s22 = sphi %s1784_s22, %s2240_s22   ;;  %s1699_s21 = sphi %s1782_s21, %s2239_s21  }
   0xd   : > { %p1816_p1 = scmp.eq.s32.totalorder %s2216_s27, 0  ;;  %p224_p2 = scmp.lt.s32.totalorder %s1719_s26, 3 }
   0xe   : > { %s1721_s30 = smov [#allocation5]   ;;  %s1722_s9 = smov [#allocation8]  }
   0xf   : > { %s2222_s28 = scalar_select %p1816_p1, 1, 0 }
  0x10   : > { %p1821_p3 = pnand %p1179_p0, %p224_p2  ;;  %s239_s7 = sshll.u32 %s1721_s30, 4  ;;  %s1825_s7 = int_to_ptr.vmem [resolvable:$true] %s239_s7 }
  0x11   : > { %s268_s10 = sshll.u32 %s1722_s9, 4  ;;  %s1723_s11 = smov [#allocation7]   ;;  %s1836_s10 = int_to_ptr.vmem [resolvable:$true] %s268_s10 }
  0x12   : > { %s2223_s29 = scalar_select %p1821_p3, 1, 0 }
  0x13   : > { %p1330_p4 = pneg %p1821_p3  ;;  %s1838_s12 = sshll.u32 %s1723_s11, 4  ;;  %s256_s12 = int_to_ptr.vmem [resolvable:$true] %s1838_s12 }
  0x14   : > { %s2225_s1 = sld [smem:[#allocation19_spill]] }
  0x15   : > { %p1832_p6 = pnand %p1330_p4, %p1816_p1 }
  0x17   : > { %p1848_p8 = pneg %p1832_p6 }
  0x1a   : > { %s1455_s15 = scalar_lea.hbm %s2225_s1, 256 }
  0x1b   : > { %p1456_p7 = scmp.ne.s32.totalorder %s2225_s1, %s1455_s15  ;;  %p1462_p11 = scmp.lt.u32.totalorder %s1455_s15, %s2225_s1 }
  0x1d   : > { %p1458_p9 = pnand %p1848_p8, %p1456_p7 }
  0x1f   : > { %p1459_p10 = pneg %p1458_p9 }
  0x21   : > { %p1464_p12 = pnand %p1462_p11, %p1459_p10 }
  0x23   : > { %1467 = shalt.err (!%p1464_p12)
}
  0x24   : > { %s1468_s30 = scalar_lea.vmem %s1825_s7, 256  ;;  %p1476_p4 = scmp.lt.s32.totalorder %s1825_s7, %s1825_s7 }
  0x25   : > { %p1469_p13 = scmp.ne.s32.totalorder %s1825_s7, %s1468_s30  ;;  %p1477_p5 = scmp.lt.s32.totalorder %s1468_s30, %s1468_s30 }
  0x27   : > { %p1471_p0 = pnand %p1469_p13, %p1848_p8  ;;  %p1478_p7 = por %p1477_p5, %p1476_p4 }
  0x29   : > { %p1472_p2 = pneg %p1471_p0 }
  0x2b   : > { %p1479_p9 = pnand %p1478_p7, %p1472_p2 }
  0x2d   : > { %1482 = shalt.err (!%p1479_p9)
}
  0x2e   : > { %s1724_s9 = smov 64   ;;  %s1725_s11 = smov 4  }
  0x2f   : > { %1333 = dma.hbm_to_vmem [thread:$0]  (!%p1832_p6), %s2225_s1, 256, %s1825_s7, [#allocation6], %s1724_s9, %s1724_s9, %s1725_s11  }
  0x30   : > { %s1483_s17 = scalar_lea.hbm %s2212_s3, 256 }
  0x31   : > { %p1484_p5 = scmp.ne.s32.totalorder %s2212_s3, %s1483_s17  ;;  %p1490_p12 = scmp.lt.u32.totalorder %s1483_s17, %s2212_s3 }
  0x33   : > { %p1486_p10 = pnand %p1484_p5, %p1848_p8 }
  0x35   : > { %p1487_p11 = pneg %p1486_p10 }
  0x37   : > { %p1492_p13 = pnand %p1490_p12, %p1487_p11 }
  0x39   : > { %1495 = shalt.err (!%p1492_p13)
}
  0x3a   : > { %s1496_s7 = scalar_lea.vmem %s1836_s10, 256  ;;  %p1504_p7 = scmp.lt.s32.totalorder %s1836_s10, %s1836_s10 }
  0x3b   : > { %p1497_p0 = scmp.ne.s32.totalorder %s1836_s10, %s1496_s7  ;;  %p1505_p9 = scmp.lt.s32.totalorder %s1496_s7, %s1496_s7 }
  0x3d   : > { %p1499_p2 = pnand %p1497_p0, %p1848_p8  ;;  %p1506_p5 = por %p1505_p9, %p1504_p7 }
  0x3f   : > { %p1500_p4 = pneg %p1499_p2 }
  0x41   : > { %p1507_p10 = pnand %p1506_p5, %p1500_p4 }
  0x43   : > { %1510 = shalt.err (!%p1507_p10)
}
  0x44   : > { %1339 = dma.hbm_to_vmem [thread:$0]  (!%p1832_p6), %s2212_s3, 256, %s1836_s10, [#allocation9], %s1724_s9, %s1724_s9, %s1725_s11  }
  0x45   : > { %s1511_s16 = scalar_lea.hbm %s2211_s2, 16 }
  0x46   : > { %p1512_p11 = scmp.ne.s32.totalorder %s2211_s2, %s1511_s16  ;;  %p1518_p0 = scmp.lt.u32.totalorder %s1511_s16, %s2211_s2 }
  0x48   : > { %p1514_p12 = pnand %p1512_p11, %p1848_p8 }
  0x4a   : > { %p1515_p13 = pneg %p1514_p12 }
  0x4c   : > { %p1520_p2 = pnand %p1518_p0, %p1515_p13 }
  0x4e   : > { %1523 = shalt.err (!%p1520_p2)
}
  0x4f   : > { %s1524_s7 = scalar_lea.vmem %s256_s12, 16  ;;  %s1531_s10 = scalar_lea.vmem %s256_s12, 32 }
  0x50   : > { %p1525_p4 = scmp.ne.s32.totalorder %s256_s12, %s1524_s7  ;;  %p1532_p5 = scmp.lt.s32.totalorder %s256_s12, %s256_s12 }
  0x51   : > { %p1533_p10 = scmp.lt.s32.totalorder %s1531_s10, %s1524_s7 }
  0x52   : > { %p1527_p7 = pnand %p1525_p4, %p1848_p8 }
  0x53   : > { %p1534_p3 = por %p1533_p10, %p1532_p5 }
  0x54   : > { %p1528_p9 = pneg %p1527_p7 }
  0x56   : > { %p1535_p1 = pnand %p1534_p3, %p1528_p9 }
  0x58   : > { %1538 = shalt.err (!%p1535_p1)
}
  0x59   : > { %1336 = dma.hbm_to_vmem [thread:$0]  (!%p1832_p6), %s2211_s2, 16, %s256_s12, [#allocation6]  }
  0x5a   : > { %s1726_s27 = smov [#allocation10]   ;;  %s1539_s16 = scalar_lea.hbm %s2213_s4, 16 }
  0x5b   : > { %s282_s13 = sshll.u32 %s1726_s27, 4  ;;  %p1540_p11 = scmp.ne.s32.totalorder %s2213_s4, %s1539_s16  ;;  %s283_s13 = int_to_ptr.vmem [resolvable:$true] %s282_s13 }
  0x5c   : > { %p1546_p12 = scmp.lt.u32.totalorder %s1539_s16, %s2213_s4 }
  0x5d   : > { %p1542_p1 = pnand %p1540_p11, %p1848_p8 }
  0x5f   : > { %p1543_p3 = pneg %p1542_p1 }
  0x61   : > { %p1548_p13 = pnand %p1546_p12, %p1543_p3 }
  0x63   : > { %1551 = shalt.err (!%p1548_p13)
}
  0x64   : > { %s1552_s12 = scalar_lea.vmem %s283_s13, 16  ;;  %s1559_s7 = scalar_lea.vmem %s283_s13, 32 }
  0x65   : > { %p1553_p0 = scmp.ne.s32.totalorder %s283_s13, %s1552_s12  ;;  %p1560_p7 = scmp.lt.s32.totalorder %s283_s13, %s283_s13 }
  0x66   : > { %p1561_p9 = scmp.lt.s32.totalorder %s1559_s7, %s1552_s12 }
  0x67   : > { %p1555_p2 = pnand %p1553_p0, %p1848_p8 }
  0x68   : > { %p1562_p5 = por %p1561_p9, %p1560_p7 }
  0x69   : > { %p1556_p4 = pneg %p1555_p2 }
  0x6b   : > { %p1563_p10 = pnand %p1562_p5, %p1556_p4 }
  0x6d   : > { %1566 = shalt.err (!%p1563_p10)
}
  0x6e   : > { %1342 = dma.hbm_to_vmem [thread:$0]  (!%p1832_p6), %s2213_s4, 16, %s283_s13, [#allocation9]  }
  0x6f   : > { %s1178_s18 = sadd.s32 4294967294, %s1719_s26   ;;  %s40_s11 = sadd.s32 1, %s1715_s25 }
  0x70   : > { %p42_p8 = scmp.ge.s32.totalorder %s40_s11, 2  ;;  %s47_s8 = sadd.s32 1, %s1707_s23 }
  0x71   : > { %p54_p11 = scmp.ne.s32.totalorder %s1707_s23, %s1703_s22  ;;  %p55_p1 = scmp.eq.s32.totalorder %s1719_s26, 0 }
  0x72   : > { %s2245_s11 = smov (%p42_p8, %s40_s11), 0  ;;  %p60_p12 = scmp.ne.s32.totalorder %s1703_s22, %s1699_s21 }
  0x73   : > { %p1937_p3 = por %p55_p1, %p54_p11  ;;  %s44_s13 = ssub.s32 %s1715_s25, %s2245_s11 }
  0x74   : > { %s2228_s14 = sadd.s32 4294967295, %s1719_s26   ;;  %p45_p13 = scmp.eq.s32.totalorder %s44_s13, 0 }
  0x75   : > { %p183_p6 = scmp.eq.s32.totalorder %s2228_s14, 1  ;;  %p2229_p0 = scmp.ne.s32.totalorder %s2222_s28, 0 }
  0x76   : > { %p189_p7 = scmp.eq.s32.totalorder %s1178_s18, 1  ;;  %p1358_p5 = scmp.lt.s32.totalorder %s1719_s26, 2 }
  0x77   : > { %p1949_p2 = por %p2229_p0, %p60_p12  ;;  %p1953_p4 = por %p183_p6, %p54_p11 }
  0x78   : > { %s1958_s17 = scalar_select %p45_p13, %s1707_s23, %s47_s8  }
  0x79   : > { %s2231_s16 = scalar_select %p1953_p4, 1, 0 }
  0x7a   : > { %p1960_p9 = por %p189_p7, %p60_p12  ;;  %s293_s20 = sand.u32 1, %s1707_s23  }
  0x7b   : > { %s1186_s30 = sshll.u32 %s1715_s25, 7  ;;  %s1185_s12 = sshll.u32 %s293_s20, 3 }
  0x7c   : > { %s2232_s19 = scalar_select %p1960_p9, 1, 0 }
  0x7d   : > { %s1970_s9 = scalar_lea.hbm %s2209_s0, %s1186_s30  ;;  %s297_s18 = scalar_lea.vmem [#allocation2], %s1185_s12 }
  0x7e   : > { %s304_s8 = sshll.u32 %s297_s18, 4  ;;  %p1974_p10 = pnand %p1358_p5, %p1937_p3  ;;  %s1978_s8 = int_to_ptr.vmem [resolvable:$true] %s304_s8 }
  0x7f   : > { %s294_s14 = scalar_lea.sflag [#allocation3], %s293_s20  ;;  %s1567_s1 = scalar_lea.hbm %s1970_s9, 128 }
  0x80   : > { %p1568_p8 = scmp.ne.s32.totalorder %s1970_s9, %s1567_s1  ;;  %p1569_p11 = pneg %p1974_p10 }
  0x81   : > { %s1572_s27 = scalar_lea.hbm %s2209_s0, 256  ;;  %p1573_p3 = scmp.lt.u32.totalorder %s1970_s9, %s2209_s0 }
  0x82   : > { %p1570_p1 = pnand %p1569_p11, %p1568_p8  ;;  %p1574_p6 = scmp.lt.u32.totalorder %s1572_s27, %s1567_s1 }
  0x83   : > { %p1576_p0 = scmp.lt.u32.totalorder %s1567_s1, %s1970_s9 }
  0x84   : > { %p1571_p12 = pneg %p1570_p1  ;;  %p1575_p13 = por %p1574_p6, %p1573_p3 }
  0x86   : > { %p1577_p7 = por %p1576_p0, %p1575_p13 }
  0x88   : > { %p1578_p5 = pnand %p1577_p7, %p1571_p12 }
  0x8a   : > { %1581 = shalt.err (!%p1578_p5)
}
  0x8b   : > { %s1582_s20 = scalar_lea.vmem %s1978_s8, 128  ;;  %s1727_s18 = smov [#allocation2]  }
  0x8c   : > { %p1583_p8 = scmp.ne.s32.totalorder %s1978_s8, %s1582_s20  ;;  %s1587_s30 = sshll.u32 %s1727_s18, 4  ;;  %s1588_s30 = int_to_ptr.vmem [resolvable:$false] %s1587_s30 }
  0x8d   : > { %s1589_s12 = scalar_lea.vmem %s1588_s30, 256  ;;  %p1590_p4 = scmp.lt.s32.totalorder %s1978_s8, %s1588_s30 }
  0x8e   : > { %p1585_p1 = pnand %p1583_p8, %p1569_p11  ;;  %p1591_p3 = scmp.lt.s32.totalorder %s1589_s12, %s1582_s20 }
  0x90   : > { %p1586_p9 = pneg %p1585_p1  ;;  %p1592_p6 = por %p1591_p3, %p1590_p4 }
  0x92   : > { %p1593_p13 = pnand %p1592_p6, %p1586_p9 }
  0x94   : > { %1596 = shalt.err (!%p1593_p13)
}
  0x95   : > { %1346 = dma.hbm_to_vmem [thread:$0]  (!%p1974_p10), %s1970_s9, 128, %s1978_s8, %s294_s14  }
  0x96   : > { %p2234_p12 = scmp.ne.s32.totalorder %s2223_s29, 0 }
  0x97   : > { %s2008_s1 = sand.u32 (!%p2234_p12), 1, %s1703_s22  }
  0x98   : > { %313 = sbr.rel (%p2234_p12) target bundleno = 1662 (0x67e), region = 40  ;;  %s1188_s27 = sshll.u32 (!%p2234_p12), %s2008_s1, 3 }
  0x99   : > { %s316_s7 = scalar_lea.sflag (!%p2234_p12), [#allocation3], %s2008_s1  ;;  %s319_s10 = scalar_lea.vmem (!%p2234_p12), [#allocation2], %s1188_s27 }
  0x9f   : > { %1678 = dma.done.wait (%p1949_p2), %s316_s7, 128  }
  0xa0   : > { %1680 = vsyncadd (%p1949_p2), %s316_s7, 4294967168  ;;  %p2235_p4 = scmp.ne.s32.totalorder %s2222_s28, 0 }
  0xa2   : > { %1682 = dma.done.wait (%p2235_p4), [#allocation6], 272  }
  0xa3   : > { %1684 = vsyncadd (%p2235_p4), [#allocation6], 4294967024 }
  0xa4   : > { %1686 = dma.done.wait (%p2235_p4), [#allocation9], 272  }
  0xa5   : > { %1688 = vsyncadd (%p2235_p4), [#allocation9], 4294967024  ;;  %v1728_v0 = vmov 0.0   ;;  %vm1729_vm0 = vmmov 0   ;;  %v1435_v1 = vld [vmem:[#allocation5] sm:$0xff]   ;;  %v1436_v2 = vld [vmem:[#allocation5 + $0x8] sm:$0xff]  }
  0xa6   : > { %1244 = vmatprep.subr.bf16.mxu0 %v1728_v0  ;;  %1248 = vmatprep.mubr.msk.bf16.mxu0 %vm1729_vm0, %v1728_v0  ;;  %v384_v3 = vld [vmem:[%s319_s10] sm:$0xff]  ;;  %vm382_vm1 = vcmask 261120   ;;  %s1730_s28 = smov 120   ;;  %s1731_s29 = smov 96   ;;  %vm457_vm2 = vcmask 64512   ;;  %vm516_vm3 = vcmask 60416  }
  0xa7   : > { %1252 = vmatprep.subr.bf16.mxu1 %v1728_v0  ;;  %1254 = vmatprep.mubr.msk.bf16.mxu1 %vm1729_vm0, %v1728_v0  ;;  %v385_v4 = vpack.c.bf16 %v384_v3, %v384_v3  ;;  %v1196_v5 = vld [vmem:[#allocation7] ss:$0 sm:$0xff]  ;;  %s1732_s15 = smov 80   ;;  %s1733_s9 = smov 88   ;;  %vm523_vm4 = vcmask 1043456   ;;  %vm916_vm5 = vcmask 130048  }
  0xa8   : > { %1245 = vmatpush3.bf16.msra.mxu0 %v1435_v1  ;;  %s1734_s8 = smov 72   ;;  %s1735_s13 = smov 112   ;;  %vm918_vm6 = vcmask 195584  }
  0xa9   : > { %1246 = vmatprep.subr.bf16.mxu0 %v1728_v0  ;;  %s1736_s14 = smov 104   ;;  %s1737_s20 = smov 56  }
  0xaa   : > { %s1738_s18 = smov 64   ;;  %s1739_s30 = smov 40  }
  0xab   : > { %s1740_s12 = smov 48   ;;  %s1194_s7 = sshll.u32 %s2008_s1, 4 }
  0xac   : > { %1247 = vmatpush3.bf16.msra.mxu0 %v1436_v2  ;;  %s2081_s10 = scalar_lea.vmem [#allocation12], %s1194_s7  ;;  %p2236_p9 = scmp.ne.s32.totalorder %s2231_s16, 0 }
  0xad   : > { %1258 = vmatprep.subr.bf16.mxu0 %v1728_v0  ;;  %s1744_s7 = smov [#allocation12]  }
  0xaf   : > { %1249 = vmatmul.mubr.msk.bf16.vlgmr.msra.gmra.mrb[0].mxu0 %vm382_vm1, %v385_v4 }
  0xb0   : > { %1260 = vmatprep.mubr.msk.bf16.mxu0 %vm1729_vm0, %v1728_v0 }
 0x182   : > { %v447_v6 = vpop.f32.mrb[0].mxu0 }
 0x183   : > { %v448_v7 = vadd.f32 %v1196_v5, %v447_v6  ;;  %v1250_v8 = vpop.f32.mrb[1].mxu0 }
 0x184   : > { %v450_v9 = vpop.f32.mrb[2].mxu0 }
 0x185   : > { %v2037_v10 = vpack.c.bf16 %v448_v7, %v448_v7  ;;  %v1251_v11 = vpop.f32.mrb[3].mxu0 }
 0x187   : > { %567 = vrot.lane.b32.xlu1 %v2037_v10, %s1730_s28  ;;  %455 = vrot.lane.b32.xlu0 %v2037_v10, %s1731_s29  ;;  %s1741_s28 = smov 8   ;;  %s2111_s29 = scalar_lea.vmem [#allocation11], %s1188_s27 }
 0x188   : > { %s1221_s27 = sshll.u32 %s1711_s24, 8 }
 0x18b   : > { %681 = vrot.lane.b32.xlu1 %v2037_v10, %s1732_s15  ;;  %569 = vrot.lane.b32.xlu0 %v2037_v10, %s1733_s9  ;;  %s1742_s15 = smov 16   ;;  %s1743_s9 = smov 24  }
 0x18f   : > { %793 = vrot.lane.b32.xlu1 %v2037_v10, %s1734_s8  ;;  %679 = vrot.lane.b32.xlu0 %v2037_v10, %s1735_s13  ;;  %s1017_s8 = sshll.u32 %s2081_s10, 4  ;;  %s2124_s8 = int_to_ptr.vmem [resolvable:$true] %s1017_s8 }
 0x193   : > { %791 = vrot.lane.b32.xlu0 %v2037_v10, %s1736_s14 }
 0x1f9   : > { %v456_v12 = vpop.permute.xlu0 %455  ;;  %v568_v15 = vpop.permute.xlu1 %567 }
 0x1fa   : > { %v462_v13 = vsel %vm457_vm2, %v456_v12, 0 }
 0x1fb   : > { %1253 = vmatpush3.bf16.xpose.msra.mxu1 %v462_v13 }
 0x1fc   : > { %1264 = vmatprep.subr.bf16.mxu1 %v1728_v0 }
 0x1fd   : > { %v570_v14 = vpop.permute.xlu0 %569  ;;  %v682_v17 = vpop.permute.xlu1 %681 }
 0x1fe   : > { %v575_v16 = vsel %vm457_vm2, %v570_v14, 0  ;;  %v687_v18 = vsel %vm457_vm2, %v682_v17, 0 }
 0x201   : > { %v794_v19 = vpop.permute.xlu1 %793  ;;  %v680_v20 = vpop.permute.xlu0 %679 }
 0x202   : > { %1255 = vmatmul.mubr.msk.bf16.vlgmr.msra.gmra.mrb[0].mxu1 %vm457_vm2, %v2037_v10  ;;  %v799_v21 = vsel %vm457_vm2, %v794_v19, 0 }
 0x203   : > { %1265 = vmatpush3.bf16.xpose.msra.mxu1 %v575_v16  ;;  %1266 = vmatprep.mubr.msk.bf16.mxu1 %vm1729_vm0, %v1728_v0 }
 0x204   : > { %1276 = vmatprep.subr.bf16.mxu1 %v1728_v0 }
 0x205   : > { %v792_v22 = vpop.permute.xlu0 %791 }
 0x20a   : > { %1267 = vmatmul.mubr.msk.bf16.vlgmr.msra.gmra.mrb[4].mxu1 %vm457_vm2, %v568_v15 }
 0x20b   : > { %1277 = vmatpush3.bf16.xpose.msra.mxu1 %v687_v18  ;;  %1278 = vmatprep.mubr.msk.bf16.mxu1 %vm1729_vm0, %v1728_v0 }
 0x20c   : > { %1288 = vmatprep.subr.bf16.mxu1 %v1728_v0 }
 0x212   : > { %1279 = vmatmul.mubr.msk.bf16.vlgmr.msra.gmra.mrb[8].mxu1 %vm457_vm2, %v680_v20 }
 0x213   : > { %1289 = vmatpush3.bf16.xpose.msra.mxu1 %v799_v21  ;;  %1290 = vmatprep.mubr.msk.bf16.mxu1 %vm1729_vm0, %v1728_v0 }
 0x214   : > { %1300 = vmatprep.subr.bf16.mxu1 %v1728_v0 }
 0x21a   : > { %1291 = vmatmul.mubr.msk.bf16.vlgmr.msra.gmra.mrb[12].mxu1 %vm457_vm2, %v792_v22 }
 0x21b   : > { %1304 = vmatprep.mubr.msk.bf16.mxu1 %vm1729_vm0, %v1728_v0 }
 0x2d5   : > { %v498_v23 = vpop.f32.mrb[0].mxu1 }
 0x2d6   : > { %v1256_v24 = vpop.f32.mrb[1].mxu1  ;;  %v504_v25 = vsel %vm457_vm2, %v498_v23, -inf }
 0x2d7   : > { %505 = vmax.xlane.f32.xlu1 %v504_v25  ;;  %v501_v26 = vpop.f32.mrb[2].mxu1 }
 0x2d8   : > { %v1257_v27 = vpop.f32.mrb[3].mxu1 }
 0x2dd   : > { %v611_v28 = vpop.f32.mrb[4].mxu1 }
 0x2de   : > { %v1268_v29 = vpop.f32.mrb[5].mxu1  ;;  %v617_v30 = vsel %vm457_vm2, %v611_v28, -inf }
 0x2df   : > { %618 = vmax.xlane.f32.xlu0 %v617_v30  ;;  %v614_v31 = vpop.f32.mrb[6].mxu1 }
 0x2e0   : > { %v1269_v32 = vpop.f32.mrb[7].mxu1 }
 0x2e1   : > { %v1437_v32 = vld [vmem:[#allocation8] sm:$0xff]  }
 0x2e2   : > { %1301 = vmatpush3.bf16.msra.mxu1 %v1437_v32 }
 0x2e3   : > { %1302 = vmatprep.subr.bf16.mxu1 %v1728_v0 }
 0x2e5   : > { %v723_v33 = vpop.f32.mrb[8].mxu1 }
 0x2e6   : > { %v1280_v34 = vpop.f32.mrb[9].mxu1  ;;  %v729_v35 = vsel %vm457_vm2, %v723_v33, -inf }
 0x2e7   : > { %730 = vmax.xlane.f32.xlu0 %v729_v35  ;;  %v726_v36 = vpop.f32.mrb[10].mxu1  ;;  %v1195_v34 = vld [vmem:[#allocation10] ss:$0 sm:$0xff] }
 0x2e8   : > { %v1281_v37 = vpop.f32.mrb[11].mxu1  ;;  %383 = vst.msk [vmem:[%s2111_s29] sm:$0xff] %vm382_vm1, %v1195_v34 }
 0x2ed   : > { %v835_v38 = vpop.f32.mrb[12].mxu1 }
 0x2ee   : > { %v1292_v39 = vpop.f32.mrb[13].mxu1  ;;  %v841_v40 = vsel %vm457_vm2, %v835_v38, -inf }
 0x2ef   : > { %842 = vmax.xlane.f32.xlu1 %v841_v40  ;;  %v838_v41 = vpop.f32.mrb[14].mxu1 }
 0x2f0   : > { %v1293_v42 = vpop.f32.mrb[15].mxu1 }
 0x364   : > { %v506_v43 = vpop.xlane.xlu1 %505 }
 0x365   : > { %v507_v44 = vsub.f32 %v498_v23, %v506_v43 }
 0x367   : > { %v508_v45 = vmul.f32 1.442695, %v507_v44 }
 0x369   : > { %1439 = vpow2.f32 %v508_v45 }
 0x36c   : > { %v619_v46 = vpop.xlane.xlu0 %618 }
 0x36d   : > { %v620_v47 = vsub.f32 %v611_v28, %v619_v46 }
 0x36f   : > { %v621_v48 = vmul.f32 1.442695, %v620_v47 }
 0x371   : > { %1441 = vpow2.f32 %v621_v48 }
 0x373   : > { %v1440_v49 = vpop.eup %1439 }
 0x374   : > { %v731_v50 = vpop.xlane.xlu0 %730  ;;  %v510_v51 = vsel %vm457_vm2, %v1440_v49, 0.0 }
 0x375   : > { %v732_v52 = vsub.f32 %v723_v33, %v731_v50  ;;  %511 = vadd.xlane.f32.xlu0 %v510_v51  ;;  %v1438_v33 = vld [vmem:[#allocation8 + $0x8] sm:$0xff]  }
 0x376   : > { %1303 = vmatpush3.bf16.msra.mxu1 %v1438_v33 }
 0x377   : > { %v733_v53 = vmul.f32 1.442695, %v732_v52 }
 0x379   : > { %1443 = vpow2.f32 %v733_v53 }
 0x37b   : > { %v1442_v54 = vpop.eup %1441 }
 0x37c   : > { %v623_v55 = vsel %vm457_vm2, %v1442_v54, 0.0  ;;  %v843_v58 = vpop.xlane.xlu1 %842 }
 0x37d   : > { %624 = vadd.xlane.f32.xlu1 %v623_v55  ;;  %v844_v59 = vsub.f32 %v835_v38, %v843_v58 }
 0x37f   : > { %v845_v60 = vmul.f32 1.442695, %v844_v59 }
 0x381   : > { %1445 = vpow2.f32 %v845_v60 }
 0x383   : > { %v1444_v56 = vpop.eup %1443 }
 0x384   : > { %v735_v57 = vsel %vm457_vm2, %v1444_v56, 0.0 }
 0x385   : > { %736 = vadd.xlane.f32.xlu0 %v735_v57 }
 0x38b   : > { %v1446_v61 = vpop.eup %1445 }
 0x38c   : > { %v847_v62 = vsel %vm457_vm2, %v1446_v61, 0.0 }
 0x38e   : > { %631 = vrot.lane.b32.xlu1 %v2037_v10, %s1737_s20  ;;  %s2122_s20 = scalar_lea.hbm %s2215_s6, %s1221_s27 }
 0x39b   : > { %518 = vrot.lane.b32.xlu0 %v2037_v10, %s1738_s18 }
 0x39f   : > { %855 = vrot.lane.b32.xlu0 %v2037_v10, %s1739_s30  ;;  %s989_s30 = scalar_lea.sflag [#allocation13], %s2008_s1 }
 0x3b2   : > { %848 = vadd.xlane.f32.xlu1 %v847_v62 }
 0x3c3   : > { %743 = vrot.lane.b32.xlu1 %v2037_v10, %s1740_s12  ;;  %s1597_s12 = scalar_lea.vmem %s2124_s8, 256 }
 0x3c4   : > { %p1598_p2 = scmp.ne.s32.totalorder %s2124_s8, %s1597_s12 }
 0x3c6   : > { %p1599_p10 = pnand %p1598_p2, %p2236_p9 }
 0x3c8   : > { %p1600_p11 = pneg %p1599_p10 }
 0x402   : > { %v512_v63 = vpop.xlane.xlu0 %511 }
 0x403   : > { %1447 = vrcp.f32 %v512_v63 }
 0x40a   : > { %v625_v1 = vpop.xlane.xlu1 %624 }
 0x40b   : > { %1449 = vrcp.f32 %v625_v1 }
 0x40d   : > { %v1448_v2 = vpop.eup %1447 }
 0x40e   : > { %v514_v3 = vmul.f32 %v1448_v2, %v1440_v49  ;;  %v632_v10 = vpop.permute.xlu1 %631 }
 0x40f   : > { %v637_v12 = vsel %vm523_vm4, %v632_v10, 0 }
 0x410   : > { %v515_v4 = vpack.c.bf16 %v514_v3, %v514_v3 }
 0x412   : > { %v737_v5 = vpop.xlane.xlu0 %736  ;;  %517 = vst.msk [vmem:[%s2081_s10] sm:$0xf] %vm516_vm3, %v515_v4 }
 0x413   : > { %1451 = vrcp.f32 %v737_v5 }
 0x415   : > { %v1450_v6 = vpop.eup %1449 }
 0x416   : > { %v627_v7 = vmul.f32 %v1450_v6, %v1442_v54  ;;  %v519_v8 = vpop.permute.xlu0 %518 }
 0x417   : > { %v525_v9 = vsel %vm523_vm4, %v519_v8, 0 }
 0x418   : > { %1259 = vmatpush3.bf16.msra.mxu0 %v525_v9  ;;  %v628_v11 = vpack.c.bf16 %v627_v7, %v627_v7 }
 0x419   : > { %1270 = vmatprep.subr.bf16.mxu0 %v1728_v0 }
 0x41a   : > { %1203 = vst.msk [vmem:[%s2081_s10 + $0x4] sm:$0xf] %vm516_vm3, %v628_v11  ;;  %v856_v19 = vpop.permute.xlu0 %855 }
 0x41b   : > { %1261 = vmatmul.mubr.msk.bf16.vlgmr.msra.gmra.mrb[4].mxu0 %vm457_vm2, %v515_v4  ;;  %v861_v20 = vsel %vm523_vm4, %v856_v19, 0 }
 0x41c   : > { %1271 = vmatpush3.bf16.msra.mxu0 %v637_v12  ;;  %1272 = vmatprep.mubr.msk.bf16.mxu0 %vm1729_vm0, %v1728_v0 }
 0x41d   : > { %v1452_v13 = vpop.eup %1451  ;;  %1282 = vmatprep.subr.bf16.mxu0 %v1728_v0 }
 0x41e   : > { %v739_v14 = vmul.f32 %v1452_v13, %v1444_v56 }
 0x420   : > { %v740_v15 = vpack.c.bf16 %v739_v14, %v739_v14 }
 0x422   : > { %1206 = vst.msk [vmem:[%s2081_s10 + $0x8] sm:$0xf] %vm516_vm3, %v740_v15 }
 0x423   : > { %1273 = vmatmul.mubr.msk.bf16.vlgmr.msra.gmra.mrb[8].mxu0 %vm457_vm2, %v628_v11 }
 0x424   : > { %1284 = vmatprep.mubr.msk.bf16.mxu0 %vm1729_vm0, %v1728_v0 }
 0x43f   : > { %v849_v16 = vpop.xlane.xlu1 %848 }
 0x440   : > { %1453 = vrcp.f32 %v849_v16 }
 0x443   : > { %v744_v17 = vpop.permute.xlu1 %743 }
 0x444   : > { %v749_v18 = vsel %vm523_vm4, %v744_v17, 0 }
 0x445   : > { %1283 = vmatpush3.bf16.msra.mxu0 %v749_v18 }
 0x446   : > { %1294 = vmatprep.subr.bf16.mxu0 %v1728_v0 }
 0x448   : > { %1285 = vmatmul.mubr.msk.bf16.vlgmr.msra.gmra.mrb[12].mxu0 %vm457_vm2, %v740_v15 }
 0x449   : > { %1295 = vmatpush3.bf16.msra.mxu0 %v861_v20  ;;  %1296 = vmatprep.mubr.msk.bf16.mxu0 %vm1729_vm0, %v1728_v0 }
 0x44a   : > { %v1454_v21 = vpop.eup %1453 }
 0x44b   : > { %v851_v22 = vmul.f32 %v1454_v21, %v1446_v61 }
 0x44d   : > { %v852_v23 = vpack.c.bf16 %v851_v22, %v851_v22 }
 0x44f   : > { %1209 = vst.msk [vmem:[%s2081_s10 + $0xc] sm:$0xf] %vm516_vm3, %v852_v23 }
 0x450   : > { %1297 = vmatmul.mubr.msk.bf16.vlgmr.msra.gmra.mrb[16].mxu0 %vm457_vm2, %v852_v23 }
 0x4ee   : > { %v561_v24 = vpop.f32.mrb[4].mxu0 }
 0x4ef   : > { %v1262_v25 = vpop.f32.mrb[5].mxu0 }
 0x4f0   : > { %v564_v26 = vpop.f32.mrb[6].mxu0 }
 0x4f1   : > { %v1263_v27 = vpop.f32.mrb[7].mxu0 }
 0x4f6   : > { %v673_v28 = vpop.f32.mrb[8].mxu0 }
 0x4f7   : > { %904 = vrot.lane.b32.xlu1 %v673_v28, %s1741_s28  ;;  %v1274_v29 = vpop.f32.mrb[9].mxu0  ;;  %s1601_s28 = sshll.u32 %s1744_s7, 4  ;;  %s1602_s28 = int_to_ptr.vmem [resolvable:$false] %s1601_s28 }
 0x4f8   : > { %v676_v30 = vpop.f32.mrb[10].mxu0  ;;  %s1603_s10 = scalar_lea.vmem %s1602_s28, 512  ;;  %p1604_p0 = scmp.lt.s32.totalorder %s2124_s8, %s1602_s28 }
 0x4f9   : > { %v1275_v31 = vpop.f32.mrb[11].mxu0  ;;  %p1605_p7 = scmp.lt.s32.totalorder %s1603_s10, %s1597_s12 }
 0x4fb   : > { %p1606_p5 = por %p1605_p7, %p1604_p0 }
 0x4fd   : > { %p1607_p8 = pnand %p1606_p5, %p1600_p11 }
 0x51b   : > { %v785_v35 = vpop.f32.mrb[12].mxu0 }
 0x51c   : > { %908 = vrot.lane.b32.xlu0 %v785_v35, %s1742_s15  ;;  %v1286_v36 = vpop.f32.mrb[13].mxu0 }
 0x51d   : > { %v788_v37 = vpop.f32.mrb[14].mxu0 }
 0x51e   : > { %v1287_v38 = vpop.f32.mrb[15].mxu0 }
 0x523   : > { %v897_v39 = vpop.f32.mrb[16].mxu0 }
 0x524   : > { %912 = vrot.lane.b32.xlu1 %v897_v39, %s1743_s9  ;;  %v1298_v0 = vpop.f32.mrb[17].mxu0 }
 0x525   : > { %v900_v40 = vpop.f32.mrb[18].mxu0 }
 0x526   : > { %v1299_v41 = vpop.f32.mrb[19].mxu0 }
 0x569   : > { %v905_v42 = vpop.permute.xlu1 %904 }
 0x56a   : > { %v915_v44 = vsel %vm457_vm2, %v561_v24, %v905_v42 }
 0x58e   : > { %v909_v43 = vpop.permute.xlu0 %908 }
 0x58f   : > { %v917_v45 = vsel %vm916_vm5, %v915_v44, %v909_v43 }
 0x596   : > { %v913_v46 = vpop.permute.xlu1 %912 }
 0x597   : > { %v919_v47 = vsel %vm918_vm6, %v917_v45, %v913_v46 }
 0x598   : > { %v920_v48 = vpack.c.bf16 %v919_v47, %v919_v47 }
 0x59a   : > { %1305 = vmatmul.mubr.msk.bf16.vlgmr.msra.gmra.mrb[16].mxu1 %vm382_vm1, %v920_v48 }
 0x59b   : > { %1610 = shalt.err (!%p1607_p8)
}
 0x59c   : > { %s1611_s15 = scalar_lea.hbm %s2122_s20, 256  ;;  %s1615_s13 = scalar_lea.hbm %s2215_s6, 512 }
 0x59d   : > { %p1612_p1 = scmp.ne.s32.totalorder %s2122_s20, %s1611_s15  ;;  %p1616_p13 = scmp.lt.u32.totalorder %s2122_s20, %s2215_s6 }
 0x59e   : > { %p1617_p12 = scmp.lt.u32.totalorder %s1615_s13, %s1611_s15  ;;  %p1619_p2 = scmp.lt.u32.totalorder %s1611_s15, %s2122_s20 }
 0x59f   : > { %p1613_p3 = pnand %p1612_p1, %p2236_p9 }
 0x5a0   : > { %p1618_p4 = por %p1617_p12, %p1616_p13 }
 0x5a1   : > { %p1614_p6 = pneg %p1613_p3 }
 0x5a2   : > { %p1620_p10 = por %p1619_p2, %p1618_p4 }
 0x5a4   : > { %p1621_p11 = pnand %p1620_p10, %p1614_p6 }
 0x5a6   : > { %1624 = shalt.err (!%p1621_p11)
}
 0x5a7   : > { %s1745_s12 = smov 4   ;;  %v921_v49 = vld [vmem:[%s2111_s29] sm:$0xff]  ;;  %s1216_s28 = sshll.u32 %s1711_s24, 7 }
 0x5a8   : > { %1327 = dma.vmem_to_hbm [thread:$0]  (%p2236_p9), %s2124_s8, 256, %s2122_s20, %s989_s30, %s1738_s18, %s1738_s18, %s1745_s12  }
 0x5a9   : > { %s1002_s10 = sshll.u32 %s2111_s29, 4  ;;  %s2158_s27 = scalar_lea.hbm %s2214_s5, %s1216_s28  ;;  %s2160_s10 = int_to_ptr.vmem [resolvable:$true] %s1002_s10 }
 0x5aa   : > { %s984_s18 = scalar_lea.sflag [#allocation4], %s2008_s1  ;;  %s1625_s24 = scalar_lea.vmem %s2160_s10, 128 }
 0x5ab   : > { %p1626_p0 = scmp.ne.s32.totalorder %s2160_s10, %s1625_s24  ;;  %s1746_s8 = smov [#allocation11]  }
 0x5ac   : > { %s1629_s20 = sshll.u32 %s1746_s8, 4  ;;  %s1630_s20 = int_to_ptr.vmem [resolvable:$false] %s1629_s20 }
 0x5ad   : > { %p1627_p7 = pnand %p1626_p0, %p2236_p9  ;;  %s1631_s30 = scalar_lea.vmem %s1630_s20, 256 }
 0x5ae   : > { %p1632_p8 = scmp.lt.s32.totalorder %s2160_s10, %s1630_s20  ;;  %p1633_p1 = scmp.lt.s32.totalorder %s1631_s30, %s1625_s24 }
 0x5af   : > { %p1628_p5 = pneg %p1627_p7 }
 0x5b0   : > { %p1634_p3 = por %p1633_p1, %p1632_p8 }
 0x5b2   : > { %p1635_p6 = pnand %p1634_p3, %p1628_p5 }
 0x66d   : > { %v975_v50 = vpop.f32.mrb[16].mxu1 }
 0x66e   : > { %v981_v51 = vadd.f32 %v975_v50, %v921_v49  ;;  %v1306_v52 = vpop.f32.mrb[17].mxu1 }
 0x66f   : > { %v978_v53 = vpop.f32.mrb[18].mxu1 }
 0x670   : > { %982 = vst.msk [vmem:[%s2111_s29] sm:$0xff] %vm382_vm1, %v981_v51  ;;  %v1307_v54 = vpop.f32.mrb[19].mxu1 }
 0x671   : > { %1638 = shalt.err (!%p1635_p6)
}
 0x672   : > { %s1639_s1 = scalar_lea.hbm %s2158_s27, 128  ;;  %s1643_s14 = scalar_lea.hbm %s2214_s5, 256 }
 0x673   : > { %p1640_p13 = scmp.ne.s32.totalorder %s2158_s27, %s1639_s1  ;;  %p1644_p2 = scmp.lt.u32.totalorder %s2158_s27, %s2214_s5 }
 0x674   : > { %p1645_p10 = scmp.lt.u32.totalorder %s1643_s14, %s1639_s1  ;;  %p1647_p0 = scmp.lt.u32.totalorder %s1639_s1, %s2158_s27 }
 0x675   : > { %p1641_p12 = pnand %p1640_p13, %p2236_p9 }
 0x676   : > { %p1646_p11 = por %p1645_p10, %p1644_p2 }
 0x677   : > { %p1642_p4 = pneg %p1641_p12 }
 0x678   : > { %p1648_p7 = por %p1647_p0, %p1646_p11 }
 0x67a   : > { %p1649_p5 = pnand %p1648_p7, %p1642_p4 }
 0x67c   : > { %1652 = shalt.err (!%p1649_p5)
}
 0x67d   : > { %1326 = dma.vmem_to_hbm [thread:$0]  (%p2236_p9), %s2160_s10, 128, %s2158_s27, %s984_s18  }
 0x67e PF: > { %s1032_s28 = sand.u32 1, %s1699_s21   ;;  %p2237_p8 = scmp.ne.s32.totalorder %s2232_s19, 0 }
 0x67f   : > { %p2238_p1 = scmp.ge.s32.totalorder %s1719_s26, 2  ;;  %s1033_s15 = scalar_lea.sflag [#allocation4], %s1032_s28 }
 0x681   : > { %p1348_p3 = pnand %p2238_p1, %p2237_p8 }
 0x683   : > { %1690 = dma.done.wait (!%p1348_p3), %s1033_s15, 128  }
 0x684   : > { %1692 = vsyncadd (!%p1348_p3), %s1033_s15, 4294967168  ;;  %s1042_s9 = scalar_lea.sflag [#allocation13], %s1032_s28 }
 0x685   : > { %1694 = dma.done.wait (!%p1348_p3), %s1042_s9, 256  }
 0x686   : > { %1696 = vsyncadd (!%p1348_p3), %s1042_s9, 4294967040  ;;  %s28_s26 = sadd.s32 1, %s1719_s26   ;;  %s2239_s21 = smov %s1703_s22 }
 0x687   : > { %p25_p6 = scmp.ge.s32.totalorder %s28_s26, 4   ;;  %s2240_s22 = smov %s1707_s23 }
 0x688   : > { %s2241_s23 = smov %s1958_s17  ;;  %s2242_s24 = smov %s1715_s25 }
 0x689   : > { %s2243_s25 = smov %s2245_s11  ;;  %27 = sbr.rel (!%p25_p6) target bundleno = 12 (0xc), region = 128 }
 0x690   :  { %1047 = vsyncpa [#allocation3], 1 }
 0x691   :  { %1049 = vsyncpa [#allocation3 + $0x1], 1 }
 0x692   :  { %1050 = vsyncpa [#allocation6], 1 }
 0x693   :  { %1051 = vsyncpa [#allocation9], 1 }
 0x694   :  { %1052 = vsyncpa [#allocation4], 1 }
 0x695   :  { %1054 = vsyncpa [#allocation4 + $0x1], 1 }
 0x696   :  { %1055 = vsyncpa [#allocation13], 1 }
 0x697   :  { %1057 = vsyncpa [#allocation13 + $0x1], 1 }

</bundles_post_ra>
